<compile_context>
chip_gen: v6e
topology: v6e:2x2x1
jax: 0.10.0
libtpu: 0.0.40
codegen_flags: <defaults>
</compile_context>

<pallas_src>
import jax
import jax.numpy as jnp
from jax.experimental import pallas as pl
from jax.experimental.pallas import tpu as pltpu

IN_FEATURES = 100
HIDDEN = 10
OUT_FEATURES = 1
HID_PAD = 128  # hidden dim padded to the 128-lane width (vreg lanes / MXU N)


def _cdiv(a, b):
    return (a + b - 1) // b


def _round_up(n, m):
    return _cdiv(n, m) * m


def feedforward_kernel(x_ref, w1_ref, p_ref, o_ref):
    # x_ref : (TB, 100)  f32 (or bf16 if the caller supplies bf16) — batch tile
    # w1_ref: (100, 128) f32/bf16, resident in VMEM across all grid steps
    # p_ref : (2, 128)   f32, resident. row 0 = b1 (padded, +1.0 at col HIDDEN),
    #                    row 1 = w2 (padded, b2 at col HIDDEN) — the b2 fold
    # o_ref : (TB, 1)    f32
    x = x_ref[...]
    w1 = w1_ref[...]
    if x.dtype != w1.dtype:
        x = x.astype(w1.dtype)  # in-kernel cast: free on an HBM-bound kernel
    h = jnp.dot(x, w1, preferred_element_type=jnp.float32)   # MXU, f32 accumulate
    h = jnp.maximum(h + p_ref[0:1, :], 0.0)                  # bias + ReLU (VPU)
    # hidden -> 1 as multiply + lane reduce (VPU + XLU); b2 is already folded into p_ref
    # via the always-on hidden unit at column HIDDEN (ReLU(1.0) * b2 == b2).
    y = jnp.sum(h * p_ref[1:2, :], axis=-1, keepdims=True)
    o_ref[...] = y.astype(o_ref.dtype)


def feedforward(x, w1, b1, w2, b2, *, tb=8192, use_bf16=True):
    """Fused Linear(100,10) -> ReLU -> Linear(10,1).

    x : (B, 100)  activations (f32, or bf16 supplied by the caller)
    w1: (100, 10) fc1 weight, already transposed to (in, out)
    b1: (10,)     fc1 bias
    w2: (10, 1)   fc2 weight, (in, out) layout
    b2: (1,)      fc2 bias
    Returns (B, 1) f32.
    """
    B, F = x.shape
    assert F == IN_FEATURES

    # ---- batch tile selection ------------------------------------------------
    tb = max(16, min(int(tb), _round_up(B, 16)))
    tb = _round_up(tb, 16)                       # sublane-safe for f32 and bf16
    if B >= 256:
        # Keep >= 2 grid steps so the "parallel" batch axis can be sharded across
        # both TensorCores on v7x (harmless on single-TC v5e/v6e).
        tb = min(tb, _round_up(_cdiv(B, 2), 16))
    if tb >= B:
        tb = B                                   # single block == full array (always legal)
    num_tiles = _cdiv(B, tb)
    # VMEM budget @ tb=8192 f32: 2 x 3.2 MiB (x) + 2 x 32 KiB (out) + ~90 KiB weights
    # ≈ 6.5 MiB → fits default scoped VMEM on v5e (16 MiB) and v6e/v7x (32 MiB).
    # If tb is pushed past ~16K rows (or x is f32 and tb ~ 32K+), set
    # pltpu.CompilerParams(vmem_limit_bytes=...) and re-budget against v7x's 64 MiB.

    # ---- tiny resident operands (one-time cost, independent of B) -------------
    # Pad only the hidden dim to 128 lanes; x keeps its natural (B, 100) layout
    # (no padded / cast HBM copy of the dominant x stream).
    w_dtype = jnp.bfloat16 if use_bf16 else x.dtype
    w1p = jnp.zeros((IN_FEATURES, HID_PAD), jnp.float32)
    w1p = w1p.at[:, :HIDDEN].set(w1.astype(jnp.float32)).astype(w_dtype)
    # params: row 0 = b1, row 1 = w2. Fold b2 via an extra always-on hidden unit:
    # column HIDDEN has w1 col == 0, b1 == 1.0, w2 == b2 → ReLU(0 + 1) * b2 == b2.
    # Padded columns HIDDEN+1..127 stay zero so they contribute nothing.
    params = jnp.zeros((2, HID_PAD), jnp.float32)
    params = params.at[0, :HIDDEN].set(b1.astype(jnp.float32))
    params = params.at[0, HIDDEN].set(1.0)
    params = params.at[1, :HIDDEN].set(w2[:, 0].astype(jnp.float32))
    params = params.at[1, HIDDEN].set(b2[0].astype(jnp.float32))

    return pl.pallas_call(
        feedforward_kernel,
        out_shape=jax.ShapeDtypeStruct((B, OUT_FEATURES), jnp.float32),
        grid=(num_tiles,),
        in_specs=[
            # x: tiled over batch. Last dim == full array dim (100) → legal and
            # lane-pad free. Ragged last block (B % tb != 0) is masked by Pallas.
            # If xprof ever shows exposed DMA on v6e, add pipeline_mode=pl.Buffered(3) here.
            pl.BlockSpec((tb, IN_FEATURES), lambda i: (i, 0)),
            pl.BlockSpec((IN_FEATURES, HID_PAD), lambda i: (0, 0)),  # w1: resident in VMEM
            pl.BlockSpec((2, HID_PAD), lambda i: (0, 0)),            # b1/w2 (+b2): resident
        ],
        # (tb, 1) output blocks: output bytes are tiny; lane-dense relayout is only a
        # few-percent v5e store-slot win, not worth the in-kernel transpose here.
        out_specs=pl.BlockSpec((tb, OUT_FEATURES), lambda i: (i, 0)),
        compiler_params=pltpu.CompilerParams(
            dimension_semantics=("parallel",),  # batch tiles are independent (v7x: both TCs)
        ),
    )(x, w1p, params)


def init_params(key):
    """Deterministic init mimicking nn.Linear default: U(-1/sqrt(fan_in), 1/sqrt(fan_in))."""
    k1, k2, k3, k4 = jax.random.split(key, 4)
    bound1 = 1.0 / jnp.sqrt(100.0)
    bound2 = 1.0 / jnp.sqrt(10.0)
    # Stored already transposed: (in_features, out_features)
    w1 = jax.random.uniform(k1, (IN_FEATURES, HIDDEN), jnp.float32, -bound1, bound1)
    b1 = jax.random.uniform(k2, (HIDDEN,), jnp.float32, -bound1, bound1)
    w2 = jax.random.uniform(k3, (HIDDEN, OUT_FEATURES), jnp.float32, -bound2, bound2)
    b2 = jax.random.uniform(k4, (OUT_FEATURES,), jnp.float32, -bound2, bound2)
    return w1, b1, w2, b2


def _check(x, w1, b1, w2, b2, out):
    # Reference matching the kernel's bf16 input quantization (f32 accumulate).
    xb = x.astype(jnp.bfloat16).astype(jnp.float32)
    w1b = w1.astype(jnp.bfloat16).astype(jnp.float32)
    h = jnp.maximum(jnp.dot(xb, w1b, precision=jax.lax.Precision.HIGHEST) + b1, 0.0)
    ref = jnp.dot(h, w2, precision=jax.lax.Precision.HIGHEST) + b2
    assert out.shape == ref.shape
    assert jnp.allclose(out, ref, atol=1e-4, rtol=1e-4), (
        f"max abs err vs bf16 ref = {jnp.max(jnp.abs(out - ref))}")
    # Loose check against the pure-f32 forward (only bf16 input quantization differs).
    ref_f32 = jnp.maximum(x @ w1 + b1, 0.0) @ w2 + b2
    assert jnp.allclose(out, ref_f32, atol=5e-2, rtol=5e-2), (
        f"max abs err vs f32 ref = {jnp.max(jnp.abs(out - ref_f32))}")


if __name__ == "__main__":
    key = jax.random.PRNGKey(0)
    kx1, kx2, kp = jax.random.split(key, 3)
    w1, b1, w2, b2 = init_params(kp)

    # Case 1: multi-tile batch with a ragged last block (300 rows -> 2 tiles of 160).
    x1 = jax.random.normal(kx1, (300, IN_FEATURES), dtype=jnp.float32)
    out1 = jax.block_until_ready(feedforward(x1, w1, b1, w2, b2))
    _check(x1, w1, b1, w2, b2, out1)

    # Case 2: tiny batch -> single full-array block (no padding, no masking).
    x2 = jax.random.normal(kx2, (12, IN_FEATURES), dtype=jnp.float32)
    out2 = jax.block_until_ready(feedforward(x2, w1, b1, w2, b2))
    _check(x2, w1, b1, w2, b2, out2)

    print("KERNEL_OK")
</pallas_src>

<mosaic_0001>
module attributes {stable_mosaic.version = 11 : i64} {
  func.func @feedforward_kernel(%arg0: i32, %arg1: memref<160x100xf32, #tpu.memory_space<vmem>>, %arg2: memref<100x128xbf16, #tpu.memory_space<vmem>>, %arg3: memref<2x128xf32, #tpu.memory_space<vmem>>, %arg4: memref<160x1xf32, #tpu.memory_space<vmem>>) attributes {dimension_semantics = [#tpu.dimension_semantics<parallel>], iteration_bounds = array<i64: 2>, scalar_prefetch = 0 : i64, scratch_operands = 0 : i64, tpu.core_type = #tpu.core_type<tc>, window_params = [{transform_indices = @transform_0, window_bounds = array<i64: 160, 100>}, {pipeline_mode = #tpu.pipeline_mode<synchronous>, transform_indices = @transform_1, window_bounds = array<i64: 100, 128>}, {pipeline_mode = #tpu.pipeline_mode<synchronous>, transform_indices = @transform_2, window_bounds = array<i64: 2, 128>}, {transform_indices = @transform_3, window_bounds = array<i64: 160, 1>}]} {
    %c0 = arith.constant 0 : index
    %c0_0 = arith.constant 0 : index
    %0 = vector.load %arg1[%c0, %c0_0] : memref<160x100xf32, #tpu.memory_space<vmem>>, vector<160x100xf32>
    %c0_1 = arith.constant 0 : index
    %c0_2 = arith.constant 0 : index
    %1 = vector.load %arg2[%c0_1, %c0_2] : memref<100x128xbf16, #tpu.memory_space<vmem>>, vector<100x128xbf16>
    %2 = arith.truncf %0 : vector<160x100xf32> to vector<160x100xbf16>
    %cst = arith.constant dense<0.000000e+00> : vector<160x128xf32>
    %3 = tpu.matmul %2, %1, %cst {dimension_numbers = #tpu.dot_dimension_numbers<[1], [0], [0], [1], [0, 0, 1, 1], [], []>} : vector<160x100xbf16>, vector<100x128xbf16>, vector<160x128xf32> -> vector<160x128xf32>
    %c0_3 = arith.constant 0 : index
    %c0_4 = arith.constant 0 : index
    %4 = vector.load %arg3[%c0_3, %c0_4] : memref<2x128xf32, #tpu.memory_space<vmem>>, vector<1x128xf32>
    %5 = vector.broadcast %4 : vector<1x128xf32> to vector<160x128xf32>
    %6 = arith.addf %3, %5 : vector<160x128xf32>
    %cst_5 = arith.constant 0.000000e+00 : f32
    %7 = vector.broadcast %cst_5 : f32 to vector<160x128xf32>
    %8 = arith.maximumf %6, %7 : vector<160x128xf32>
    %c1 = arith.constant 1 : index
    %c0_6 = arith.constant 0 : index
    %9 = vector.load %arg3[%c1, %c0_6] : memref<2x128xf32, #tpu.memory_space<vmem>>, vector<1x128xf32>
    %10 = vector.broadcast %9 : vector<1x128xf32> to vector<160x128xf32>
    %11 = arith.mulf %8, %10 : vector<160x128xf32>
    %cst_7 = arith.constant dense<0.000000e+00> : vector<160xf32>
    %12 = vector.multi_reduction <add>, %11, %cst_7 [1] : vector<160x128xf32> to vector<160xf32>
    %13 = vector.shape_cast %12 : vector<160xf32> to vector<160x1xf32>
    %c0_8 = arith.constant 0 : index
    %c0_9 = arith.constant 0 : index
    %14 = vector.load %arg4[%c0_8, %c0_9] : memref<160x1xf32, #tpu.memory_space<vmem>>, vector<160x1xf32>
    tpu.vector_store %arg4[%c0_8, %c0_9], %13 {strides = array<i32>} : memref<160x1xf32, #tpu.memory_space<vmem>>, vector<160x1xf32>,
    return
  }
  func.func @transform_0(%arg0: i32) -> (i32, i32) {
    %c0_i32 = arith.constant 0 : i32
    %c0_i32_0 = arith.constant 0 : i32
    return %arg0, %c0_i32 : i32, i32
  }
  func.func @transform_1(%arg0: i32) -> (i32, i32) {
    %c0_i32 = arith.constant 0 : i32
    %c0_i32_0 = arith.constant 0 : i32
    %c0_i32_1 = arith.constant 0 : i32
    return %c0_i32, %c0_i32_0 : i32, i32
  }
  func.func @transform_2(%arg0: i32) -> (i32, i32) {
    %c0_i32 = arith.constant 0 : i32
    %c0_i32_0 = arith.constant 0 : i32
    %c0_i32_1 = arith.constant 0 : i32
    return %c0_i32, %c0_i32_0 : i32, i32
  }
  func.func @transform_3(%arg0: i32) -> (i32, i32) {
    %c0_i32 = arith.constant 0 : i32
    %c0_i32_0 = arith.constant 0 : i32
    return %arg0, %c0_i32 : i32, i32
  }
}

</mosaic_0001>

<bundles_post_ra>
// kernel: tpu_custom_call.1
= control target key start
LH: loop header
LB: loop body
LE: loop exit
PB: predicated region body
PF: predicated region fallthrough
CT: control target
= control target key end

     0   :  { %8 = vsyncpa [#allocation3], 0  ;;  %s1644_s0 = inlined_call_operand.hbm [shape: f32[300,100], index: 0, kind: input, shape index: {}]   ;;  %s1645_s1 = inlined_call_operand.hbm [shape: bf16[100,128], index: 1, kind: input, shape index: {}]   ;;  %s1646_s2 = inlined_call_operand.vmem [shape: f32[2,128], index: 2, kind: input, shape index: {}]   ;;  %s1647_s3 = inlined_call_operand.vmem [shape: f32[300,1], index: 3, kind: output, shape index: {}]  }
   0x1   :  { %10 = vsyncpa [#allocation3 + $0x1], 0 }
   0x2   :  { %11 = vsyncpa [#allocation5], 0  ;;  %s1292_s12 = smov 0   ;;  %s1294_s13 = smov 0  }
   0x3   :  { %s1296_s14 = smov 0   ;;  %s1298_s15 = smov 0  }
   0x4 LB: > { %s1311_s16 = sadd.s32 4294967295, %s1232_s15   ;;  %s1314_s17 = sadd.s32 1, %s1232_s15   ;;  %s1232_s15 = sphi %s1298_s15, %s1661_s15   ;;  %s1228_s14 = sphi %s1296_s14, %s1660_s14   ;;  %s1224_s13 = sphi %s1294_s13, %s1659_s13   ;;  %s1220_s12 = sphi %s1292_s12, %s1658_s12  }
   0x5   : > { %s21_s18 = ssub.s32 %s1232_s15, %s1314_s17  ;;  %s24_s19 = sadd.s32 1, %s1228_s14 }
   0x6   : > { %p22_p0 = scmp.eq.s32.totalorder %s21_s18, 0  ;;  %p31_p1 = scmp.ne.s32.totalorder %s1228_s14, %s1224_s13 }
   0x7   : > { %p32_p2 = scmp.eq.s32.totalorder %s1232_s15, 0  ;;  %p37_p3 = scmp.ne.s32.totalorder %s1224_s13, %s1220_s12 }
   0x8   : > { %s1324_s20 = scalar_select %p22_p0, %s1228_s14, %s24_s19  }
   0x9   : > { %p1326_p4 = por %p32_p2, %p31_p1  ;;  %p38_p5 = scmp.eq.s32.totalorder %s1311_s16, 0 }
   0xa   : > { %p103_p6 = scmp.eq.s32.totalorder %s1311_s16, 1  ;;  %p874_p7 = scmp.ge.s32.totalorder %s1232_s15, 1 }
   0xb   : > { %p1335_p8 = por %p38_p5, %p37_p3  ;;  %p116_p9 = scmp.lt.s32.totalorder %s1232_s15, 3 }
   0xc   : > { %p1340_p10 = por %p103_p6, %p31_p1  ;;  %s1266_s25 = smov [#allocation4]  }
   0xd   : > { %s1650_s22 = scalar_select %p1335_p8, 1, 0 }
   0xe   : > { %s1651_s23 = scalar_select %p1340_p10, 1, 0 }
   0xf   : > { %p1344_p11 = pnand %p874_p7, %p116_p9  ;;  %s128_s26 = sshll.u32 %s1266_s25, 4  ;;  %s129_s26 = int_to_ptr.vmem [resolvable:$true] %s128_s26 }
  0x10   : > { %s1121_s27 = scalar_lea.vmem %s129_s26, 832  ;;  %p1129_p6 = scmp.lt.s32.totalorder %s129_s26, %s129_s26 }
  0x11   : > { %p991_p12 = pneg %p1344_p11  ;;  %p1122_p2 = scmp.ne.s32.totalorder %s129_s26, %s1121_s27 }
  0x12   : > { %p1130_p8 = scmp.lt.s32.totalorder %s1121_s27, %s1121_s27 }
  0x13   : > { %p992_p13 = pnand %p991_p12, %p38_p5 }
  0x14   : > { %p1131_p10 = por %p1130_p8, %p1129_p6 }
  0x15   : > { %p1112_p0 = pneg %p992_p13 }
  0x17   : > { %p1124_p3 = pnand %p1122_p2, %p1112_p0 }
  0x19   : > { %p1125_p1 = pneg %p1124_p3 }
  0x1b   : > { %p1132_p7 = pnand %p1131_p10, %p1125_p1 }
  0x1d   : > { %1135 = shalt.err (!%p1132_p7)
}
  0x1e   : > { %s1267_s28 = smov 64   ;;  %s1268_s29 = smov 4  }
  0x1f   : > { %994 = dma.hbm_to_vmem [thread:$0]  (!%p992_p13), %s1645_s1, 832, %s129_s26, [#allocation5], %s1267_s28, %s1267_s28, %s1268_s29  }
  0x20   : > { %p876_p9 = scmp.ge.s32.totalorder %s1232_s15, 2 }
  0x22   : > { %141 = sbr.rel (%p876_p9) target bundleno = 73 (0x49), region = 24 }
  0x27   : > { %144 = sbr.rel (!%p1326_p4) target bundleno = 73 (0x49), region = 28  ;;  %s145_s5 = sand.u32 (%p1326_p4), 1, %s1228_s14  }
  0x28   : > { %s150_s6 = smul.u32 (%p1326_p4), 20, %s1232_s15  ;;  %s1363_s11 = scalar_lea.sflag (%p1326_p4), [#allocation3], %s145_s5 }
  0x29   : > { %s984_s7 = smul.u32 (%p1326_p4), 160, %s145_s5 }
  0x2a   : > { %s151_s8 = ssub.s32 (%p1326_p4), 38, %s150_s6 }
  0x2b   : > { %p152_p8 = scmp.lt.s32.totalorder (%p1326_p4), %s151_s8, 20  ;;  %s149_s12 = scalar_lea.vmem (%p1326_p4), [#allocation2], %s984_s7 }
  0x2d   : > { %s1663_s8 = smov (!%p152_p8, %s151_s8), 20 }
  0x2e   : > { %s1360_s9 = sshll.u32 %s1663_s8, 7 }
  0x2f   : > { %s156_s10 = ssub.s32 2560, %s1360_s9 }
  0x30   : > { %157 = vsyncadd %s1363_s11, %s156_s10  ;;  %p878_p4 = scmp.ne.s32.totalorder %s1360_s9, 0  ;;  %s915_s18 = smul.u32 2560, %s1232_s15 }
  0x31   : > { %s162_s19 = sshll.u32 %s149_s12, 4  ;;  %s1140_s15 = scalar_lea.hbm %s1644_s0, 4864  ;;  %s1373_s19 = int_to_ptr.vmem [resolvable:$true] %s162_s19 }
  0x32   : > { %s1371_s26 = scalar_lea.hbm %s1644_s0, %s915_s18 }
  0x33   : > { %s1136_s27 = scalar_lea.hbm %s1371_s26, %s1360_s9  ;;  %p1141_p0 = scmp.lt.s32.totalorder %s1371_s26, %s1644_s0 }
  0x34   : > { %p1137_p10 = scmp.ne.s32.totalorder %s1371_s26, %s1136_s27  ;;  %p1142_p2 = scmp.lt.s32.totalorder %s1140_s15, %s1136_s27 }
  0x36   : > { %p1138_p12 = pnand %p1137_p10, %p878_p4  ;;  %p1143_p3 = por %p1142_p2, %p1141_p0 }
  0x38   : > { %p1139_p13 = pneg %p1138_p12 }
  0x3a   : > { %p1144_p1 = pnand %p1143_p3, %p1139_p13 }
  0x3c   : > { %1147 = shalt.err (!%p1144_p1)
}
  0x3d   : > { %s1148_s5 = scalar_lea.vmem %s1373_s19, %s1360_s9  ;;  %s1269_s6 = smov [#allocation2]  }
  0x3e   : > { %p1149_p6 = scmp.ne.s32.totalorder %s1373_s19, %s1148_s5  ;;  %s1152_s7 = sshll.u32 %s1269_s6, 4  ;;  %s1153_s7 = int_to_ptr.vmem [resolvable:$false] %s1152_s7 }
  0x3f   : > { %s1154_s8 = scalar_lea.vmem %s1153_s7, 5120  ;;  %p1155_p8 = scmp.lt.s32.totalorder %s1373_s19, %s1153_s7 }
  0x40   : > { %p1150_p7 = pnand %p1149_p6, %p878_p4  ;;  %p1156_p10 = scmp.lt.s32.totalorder %s1154_s8, %s1148_s5 }
  0x42   : > { %p1151_p9 = pneg %p1150_p7  ;;  %p1157_p12 = por %p1156_p10, %p1155_p8 }
  0x44   : > { %p1158_p0 = pnand %p1157_p12, %p1151_p9 }
  0x46   : > { %1161 = shalt.err (!%p1158_p0)
}
  0x47   : > { %s1270_s10 = smov 128   ;;  %s1271_s12 = smov 8  }
  0x48   : > { %168 = dma.hbm_to_vmem [thread:$0]  (%p878_p4), %s1371_s26, %s1360_s9, %s1373_s19, %s1363_s11, %s1270_s10, %s1270_s10, %s1271_s12  }
  0x49 PF: > { %174 = sbr.rel (%p1344_p11) target bundleno = 541 (0x21d), region = 32  ;;  %s176_s18 = sand.u32 (!%p1344_p11), 1, %s1224_s13  }
  0x4a   : > { %s1402_s21 = smul.u32 (!%p1344_p11), 160, %s176_s18  ;;  %s177_s25 = scalar_lea.sflag (!%p1344_p11), [#allocation3], %s176_s18 }
  0x4b   : > { %p1653_p13 = scmp.ne.s32.totalorder (!%p1344_p11), %s1650_s22, 0 }
  0x4c   : > { %s1405_s27 = scalar_lea.vmem (!%p1344_p11), [#allocation2], %s1402_s21 }
  0x4e   : > { %1211 = dma.done.wait (%p1653_p13), %s177_s25, 2560  }
  0x4f   : > { %1213 = vsyncadd (%p1653_p13), %s177_s25, 4294964736 }
  0x50   : > { %1215 = dma.done.wait (%p38_p5), [#allocation5], 832  }
  0x51   : > { %1217 = vsyncadd (%p38_p5), [#allocation5], 4294966464  ;;  %vm335_vm0 = vcmask 1041408   ;;  %v1099_v0 = vld [vmem:[#allocation4 + $0x30] ss:$0 sps:$4 sm:$0x33]  }
  0x52   : > { %v1100_v1 = vld [vmem:[#allocation4 + $0x28] sm:$0xff]   ;;  %982 = vmatprep.subr.msk.bf16.mxu0 %vm335_vm0, %v1099_v0  ;;  %983 = vmatprep.subr.msk.bf16.mxu1 %vm335_vm0, %v1099_v0  ;;  %v337_v2 = vsel %vm335_vm0, %v1099_v0, 0  ;;  %v1101_v3 = vld [vmem:[#allocation4 + $0x20] sm:$0xff]   ;;  %vm304_vm1 = vcmask 818176   ;;  %v1102_v8 = vld [vmem:[#allocation4 + $0x18] sm:$0xff]   ;;  %vm537_vm2 = vcmask 7168  }
  0x53   : > { %935 = vmatpush3.bf16.msra.mxu0 %v337_v2  ;;  %975 = vmatpush3.bf16.msra.mxu1 %v337_v2  ;;  %v217_v4 = vld [vmem:[%s1405_s27] sm:$0xff]  ;;  %v218_v5 = vld [vmem:[%s1405_s27 + $0x8] sm:$0xff]  ;;  %v1103_v11 = vld [vmem:[#allocation4 + $0x10] sm:$0xff]   ;;  %s1496_s19 = scalar_lea.vmem [#allocation6], %s1402_s21   ;;  %p1654_p5 = scmp.ne.s32.totalorder %s1651_s23, 0 }
  0x54   : > { %936 = vmatprep.subr.bf16.mxu0 %v1100_v1  ;;  %969 = vmatprep.subr.bf16.mxu1 %v1100_v1  ;;  %v229_v6 = vld [vmem:[%s1405_s27 + $0x60] sm:$0xff]  ;;  %v230_v7 = vld [vmem:[%s1405_s27 + $0x68] sm:$0xff]  ;;  %v250_v9 = vpack.c.bf16 %v218_v5, %v217_v4  ;;  %v219_v14 = vld [vmem:[%s1405_s27 + $0x10] sm:$0xff]  ;;  %s565_s26 = smul.u32 (%p1654_p5), 20, %s1311_s16 }
  0x55   : > { %v256_v10 = vpack.c.bf16 %v230_v7, %v229_v6  ;;  %v1104_v12 = vld [vmem:[#allocation4 + $0x8] sm:$0xff]   ;;  %v1105_v13 = vld [vmem:[#allocation4] sm:$0xff]   ;;  %v220_v15 = vld [vmem:[%s1405_s27 + $0x18] sm:$0xff]  ;;  %s916_s28 = smul.u32 (%p1654_p5), 160, %s1311_s16 }
  0x56   : > { %948 = vmatprep.mubr.msk.bf16.mxu0 %vm304_vm1, %v250_v9  ;;  %v231_v16 = vld [vmem:[%s1405_s27 + $0x70] sm:$0xff]  ;;  %v232_v17 = vld [vmem:[%s1405_s27 + $0x78] sm:$0xff]  ;;  %v221_v18 = vld [vmem:[%s1405_s27 + $0x20] sm:$0xff]  ;;  %v251_v22 = vpack.c.bf16 %v220_v15, %v219_v14  ;;  %s566_s29 = ssub.s32 (%p1654_p5), 38, %s565_s26 }
  0x57   : > { %937 = vmatpush3.bf16.msra.mxu0 %v1100_v1  ;;  %976 = vmatpush3.bf16.msra.mxu1 %v1100_v1  ;;  %v222_v19 = vld [vmem:[%s1405_s27 + $0x28] sm:$0xff]  ;;  %v233_v20 = vld [vmem:[%s1405_s27 + $0x80] sm:$0xff]  ;;  %v257_v23 = vpack.c.bf16 %v232_v17, %v231_v16  ;;  %v223_v26 = vld [vmem:[%s1405_s27 + $0x30] sm:$0xff]  ;;  %p567_p11 = scmp.lt.s32.totalorder (%p1654_p5), %s566_s29, 20  ;;  %s1545_s4 = scalar_lea.vmem (%p1654_p5), %s1647_s3, %s916_s28  }
  0x58   : > { %938 = vmatprep.subr.bf16.mxu0 %v1101_v3  ;;  %970 = vmatprep.subr.bf16.mxu1 %v1101_v3  ;;  %v234_v21 = vld [vmem:[%s1405_s27 + $0x88] sm:$0xff]  ;;  %v252_v24 = vpack.c.bf16 %v222_v19, %v221_v18  ;;  %v224_v27 = vld [vmem:[%s1405_s27 + $0x38] sm:$0xff]  ;;  %v235_v28 = vld [vmem:[%s1405_s27 + $0x90] sm:$0xff] }
  0x59   : > { %960 = vmatprep.mubr.msk.bf16.mxu1 %vm304_vm1, %v256_v10  ;;  %v258_v25 = vpack.c.bf16 %v234_v21, %v233_v20  ;;  %v236_v29 = vld [vmem:[%s1405_s27 + $0x98] sm:$0xff]  ;;  %v225_v30 = vld [vmem:[%s1405_s27 + $0x40] sm:$0xff]  ;;  %v226_v31 = vld [vmem:[%s1405_s27 + $0x48] sm:$0xff]  ;;  %v253_v32 = vpack.c.bf16 %v224_v27, %v223_v26 }
  0x5a   : > { %v259_v33 = vpack.c.bf16 %v236_v29, %v235_v28  ;;  %v254_v34 = vpack.c.bf16 %v226_v31, %v225_v30  ;;  %v227_v35 = vld [vmem:[%s1405_s27 + $0x50] sm:$0xff]  ;;  %v228_v36 = vld [vmem:[%s1405_s27 + $0x58] sm:$0xff]  ;;  %v1448_v38 = vld [vmem:[%s1646_s2] ss:$0 sm:$0xff] }
  0x5b   : > { %939 = vmatpush3.bf16.msra.mxu0 %v1101_v3  ;;  %977 = vmatpush3.bf16.msra.mxu1 %v1101_v3  ;;  %v255_v37 = vpack.c.bf16 %v228_v36, %v227_v35  ;;  %v1456_v48 = vld [vmem:[%s1646_s2 + $0x1] ss:$0 sm:$0xff] }
  0x5c   : > { %940 = vmatprep.subr.bf16.mxu0 %v1102_v8  ;;  %971 = vmatprep.subr.bf16.mxu1 %v1102_v8 }
  0x5f   : > { %941 = vmatpush3.bf16.msra.mxu0 %v1102_v8  ;;  %978 = vmatpush3.bf16.msra.mxu1 %v1102_v8 }
  0x60   : > { %942 = vmatprep.subr.bf16.mxu0 %v1103_v11  ;;  %972 = vmatprep.subr.bf16.mxu1 %v1103_v11 }
  0x63   : > { %943 = vmatpush3.bf16.msra.mxu0 %v1103_v11  ;;  %979 = vmatpush3.bf16.msra.mxu1 %v1103_v11 }
  0x64   : > { %944 = vmatprep.subr.bf16.mxu0 %v1104_v12  ;;  %973 = vmatprep.subr.bf16.mxu1 %v1104_v12 }
  0x67   : > { %945 = vmatpush3.bf16.msra.mxu0 %v1104_v12  ;;  %980 = vmatpush3.bf16.msra.mxu1 %v1104_v12 }
  0x68   : > { %946 = vmatprep.subr.bf16.mxu0 %v1105_v13  ;;  %974 = vmatprep.subr.bf16.mxu1 %v1105_v13 }
  0x6b   : > { %947 = vmatpush3.bf16.msra.mxu0 %v1105_v13  ;;  %981 = vmatpush3.bf16.msra.mxu1 %v1105_v13 }
  0x6e   : > { %949 = vmatmul.mubr.msk.bf16.vlgmr.msra.gmra.mxu0 %vm304_vm1, %v251_v22  ;;  %961 = vmatmul.mubr.msk.bf16.vlgmr.msra.gmra.mxu1 %vm304_vm1, %v257_v23 }
  0x6f   : > { %952 = vmatprep.mubr.msk.bf16.mxu0 %vm304_vm1, %v252_v24  ;;  %964 = vmatprep.mubr.msk.bf16.mxu1 %vm304_vm1, %v258_v25 }
  0x76   : > { %953 = vmatmul.mubr.msk.bf16.gmra.mxu0 %vm304_vm1, %v253_v32  ;;  %965 = vmatmul.mubr.msk.bf16.gmra.mxu1 %vm304_vm1, %v259_v33 }
  0x77   : > { %956 = vmatprep.mubr.msk.bf16.mxu0 %vm304_vm1, %v254_v34 }
  0x7e   : > { %957 = vmatmul.mubr.msk.bf16.gmra.mxu0 %vm304_vm1, %v255_v37 }
 0x12e   : > { %v950_v39 = vpop.f32.mrf.mxu0  ;;  %v962_v40 = vpop.f32.mrf.mxu1 }
 0x12f   : > { %v382_v41 = vadd.f32 %v950_v39, %v1448_v38  ;;  %v430_v42 = vadd.f32 %v962_v40, %v1448_v38 }
 0x130   : > { %v373_v43 = vpop.f32.mrf.mxu0  ;;  %v421_v44 = vpop.f32.mrf.mxu1 }
 0x131   : > { %v454_v45 = vmax.f32 %v382_v41, 0.0  ;;  %v466_v46 = vmax.f32 %v430_v42, 0.0  ;;  %v374_v47 = vadd.f32 %v1448_v38, %v373_v43  ;;  %v422_v51 = vadd.f32 %v1448_v38, %v421_v44 }
 0x132   : > { %v951_v49 = vpop.f32.mrf.mxu0  ;;  %v963_v50 = vpop.f32.mrf.mxu1 }
 0x133   : > { %v385_v52 = vadd.f32 %v951_v49, %v1448_v38  ;;  %v452_v53 = vmax.f32 %v374_v47, 0.0  ;;  %v433_v54 = vadd.f32 %v963_v50, %v1448_v38  ;;  %v491_v57 = vmul.f32 %v1456_v48, %v466_v46 }
 0x134   : > { %v376_v55 = vpop.f32.mrf.mxu0  ;;  %v424_v56 = vpop.f32.mrf.mxu1  ;;  %v479_v58 = vmul.f32 %v1456_v48, %v454_v45  ;;  %v464_v62 = vmax.f32 %v422_v51, 0.0 }
 0x135   : > { %v455_v59 = vmax.f32 %v385_v52, 0.0  ;;  %525 = vadd.xlane.f32.xlu0 %v491_v57  ;;  %v467_v0 = vmax.f32 %v433_v54, 0.0  ;;  %v377_v1 = vadd.f32 %v1448_v38, %v376_v55  ;;  %v425_v2 = vadd.f32 %v1448_v38, %v424_v56 }
 0x136   : > { %501 = vadd.xlane.f32.xlu1 %v479_v58  ;;  %v954_v60 = vpop.f32.mrf.mxu0  ;;  %v966_v61 = vpop.f32.mrf.mxu1  ;;  %v477_v4 = vmul.f32 %v1456_v48, %v452_v53  ;;  %v489_v8 = vmul.f32 %v1456_v48, %v464_v62 }
 0x137   : > { %v480_v63 = vmul.f32 %v1456_v48, %v455_v59  ;;  %v398_v7 = vadd.f32 %v954_v60, %v1448_v38  ;;  %v453_v9 = vmax.f32 %v377_v1, 0.0  ;;  %v465_v10 = vmax.f32 %v425_v2, 0.0 }
 0x138   : > { %v389_v3 = vpop.f32.mrf.mxu0  ;;  %v437_v5 = vpop.f32.mrf.mxu1  ;;  %v492_v13 = vmul.f32 %v1456_v48, %v467_v0  ;;  %v446_v45 = vadd.f32 %v966_v61, %v1448_v38 }
 0x139   : > { %497 = vadd.xlane.f32.xlu0 %v477_v4  ;;  %v458_v16 = vmax.f32 %v398_v7, 0.0  ;;  %v390_v17 = vadd.f32 %v1448_v38, %v389_v3  ;;  %v490_v20 = vmul.f32 %v1456_v48, %v465_v10  ;;  %v478_v21 = vmul.f32 %v1456_v48, %v453_v9 }
 0x13a   : > { %503 = vadd.xlane.f32.xlu1 %v480_v63  ;;  %v955_v6 = vpop.f32.mrf.mxu0  ;;  %v967_v14 = vpop.f32.mrf.mxu1  ;;  %v438_v25 = vadd.f32 %v1448_v38, %v437_v5  ;;  %v470_v52 = vmax.f32 %v446_v45, 0.0 }
 0x13b   : > { %v401_v11 = vadd.f32 %v955_v6, %v1448_v38  ;;  %v456_v24 = vmax.f32 %v390_v17, 0.0  ;;  %v483_v29 = vmul.f32 %v1456_v48, %v458_v16  ;;  %v449_v46 = vadd.f32 %v967_v14, %v1448_v38 }
 0x13c   : > { %v392_v12 = vpop.f32.mrf.mxu0  ;;  %v440_v22 = vpop.f32.mrf.mxu1  ;;  %v468_v31 = vmax.f32 %v438_v25, 0.0 }
 0x13d   : > { %521 = vadd.xlane.f32.xlu0 %v489_v8  ;;  %v459_v18 = vmax.f32 %v401_v11, 0.0  ;;  %v393_v19 = vadd.f32 %v1448_v38, %v392_v12  ;;  %v441_v27 = vadd.f32 %v1448_v38, %v440_v22  ;;  %v481_v36 = vmul.f32 %v1456_v48, %v456_v24 }
 0x13e   : > { %527 = vadd.xlane.f32.xlu1 %v492_v13  ;;  %v958_v15 = vpop.f32.mrf.mxu0  ;;  %v493_v40 = vmul.f32 %v1456_v48, %v468_v31  ;;  %v471_v53 = vmax.f32 %v449_v46, 0.0 }
 0x13f   : > { %v457_v26 = vmax.f32 %v393_v19, 0.0  ;;  %v484_v28 = vmul.f32 %v1456_v48, %v459_v18  ;;  %v414_v32 = vadd.f32 %v958_v15, %v1448_v38  ;;  %v469_v33 = vmax.f32 %v441_v27, 0.0 }
 0x140   : > { %v405_v23 = vpop.f32.mrf.mxu0  ;;  %v496_v56 = vmul.f32 %v1456_v48, %v471_v53 }
 0x141   : > { %499 = vadd.xlane.f32.xlu0 %v478_v21  ;;  %v482_v35 = vmul.f32 %v1456_v48, %v457_v26  ;;  %v462_v39 = vmax.f32 %v414_v32, 0.0  ;;  %v406_v41 = vadd.f32 %v1448_v38, %v405_v23  ;;  %v494_v44 = vmul.f32 %v1456_v48, %v469_v33 }
 0x142   : > { %523 = vadd.xlane.f32.xlu1 %v490_v20  ;;  %v959_v30 = vpop.f32.mrf.mxu0 }
 0x143   : > { %v417_v34 = vadd.f32 %v959_v30, %v1448_v38  ;;  %v460_v47 = vmax.f32 %v406_v41, 0.0  ;;  %v487_v51 = vmul.f32 %v1456_v48, %v462_v39 }
 0x144   : > { %v408_v37 = vpop.f32.mrf.mxu0 }
 0x145   : > { %509 = vadd.xlane.f32.xlu0 %v483_v29  ;;  %v463_v42 = vmax.f32 %v417_v34, 0.0  ;;  %v409_v43 = vadd.f32 %v1448_v38, %v408_v37  ;;  %v485_v55 = vmul.f32 %v1456_v48, %v460_v47  ;;  %v495_v38 = vmul.f32 %v1456_v48, %v470_v52 }
 0x146   : > { %511 = vadd.xlane.f32.xlu1 %v484_v28 }
 0x147   : > { %v461_v49 = vmax.f32 %v409_v43, 0.0  ;;  %v488_v50 = vmul.f32 %v1456_v48, %v463_v42 }
 0x149   : > { %505 = vadd.xlane.f32.xlu0 %v481_v36  ;;  %v486_v54 = vmul.f32 %v1456_v48, %v461_v49 }
 0x14a   : > { %507 = vadd.xlane.f32.xlu1 %v482_v35 }
 0x14d   : > { %529 = vadd.xlane.f32.xlu0 %v493_v40 }
 0x14e   : > { %531 = vadd.xlane.f32.xlu1 %v494_v44 }
 0x151   : > { %517 = vadd.xlane.f32.xlu0 %v487_v51 }
 0x152   : > { %519 = vadd.xlane.f32.xlu1 %v488_v50 }
 0x155   : > { %513 = vadd.xlane.f32.xlu0 %v485_v55 }
 0x156   : > { %515 = vadd.xlane.f32.xlu1 %v486_v54 }
 0x159   : > { %533 = vadd.xlane.f32.xlu0 %v495_v38 }
 0x15a   : > { %535 = vadd.xlane.f32.xlu1 %v496_v56 }
 0x1be   : > { %v526_v57 = vpop.xlane.xlu0 %525 }
 0x1bf   : > { %v502_v58 = vpop.xlane.xlu1 %501  ;;  %552 = vst.msk [vmem:[%s1496_s19 + $0x70] sm:$0xff] %vm537_vm2, %v526_v57 }
 0x1c0   : > { %540 = vst.msk [vmem:[%s1496_s19 + $0x10] sm:$0xff] %vm537_vm2, %v502_v58 }
 0x1c2   : > { %v498_v59 = vpop.xlane.xlu0 %497 }
 0x1c3   : > { %v504_v48 = vpop.xlane.xlu1 %503  ;;  %538 = vst.msk [vmem:[%s1496_s19] sm:$0xff] %vm537_vm2, %v498_v59 }
 0x1c4   : > { %541 = vst.msk [vmem:[%s1496_s19 + $0x18] sm:$0xff] %vm537_vm2, %v504_v48 }
 0x1c6   : > { %v522_v61 = vpop.xlane.xlu0 %521 }
 0x1c7   : > { %v528_v60 = vpop.xlane.xlu1 %527  ;;  %550 = vst.msk [vmem:[%s1496_s19 + $0x60] sm:$0xff] %vm537_vm2, %v522_v61 }
 0x1c8   : > { %553 = vst.msk [vmem:[%s1496_s19 + $0x78] sm:$0xff] %vm537_vm2, %v528_v60 }
 0x1ca   : > { %v500_v63 = vpop.xlane.xlu0 %499 }
 0x1cb   : > { %v524_v62 = vpop.xlane.xlu1 %523  ;;  %539 = vst.msk [vmem:[%s1496_s19 + $0x8] sm:$0xff] %vm537_vm2, %v500_v63 }
 0x1cc   : > { %551 = vst.msk [vmem:[%s1496_s19 + $0x68] sm:$0xff] %vm537_vm2, %v524_v62 }
 0x1ce   : > { %v510_v1 = vpop.xlane.xlu0 %509 }
 0x1cf   : > { %v512_v0 = vpop.xlane.xlu1 %511  ;;  %544 = vst.msk [vmem:[%s1496_s19 + $0x30] sm:$0xff] %vm537_vm2, %v510_v1 }
 0x1d0   : > { %545 = vst.msk [vmem:[%s1496_s19 + $0x38] sm:$0xff] %vm537_vm2, %v512_v0 }
 0x1d2   : > { %v506_v3 = vpop.xlane.xlu0 %505 }
 0x1d3   : > { %v508_v2 = vpop.xlane.xlu1 %507  ;;  %542 = vst.msk [vmem:[%s1496_s19 + $0x20] sm:$0xff] %vm537_vm2, %v506_v3 }
 0x1d4   : > { %543 = vst.msk [vmem:[%s1496_s19 + $0x28] sm:$0xff] %vm537_vm2, %v508_v2 }
 0x1d6   : > { %v530_v5 = vpop.xlane.xlu0 %529 }
 0x1d7   : > { %v532_v4 = vpop.xlane.xlu1 %531  ;;  %554 = vst.msk [vmem:[%s1496_s19 + $0x80] sm:$0xff] %vm537_vm2, %v530_v5 }
 0x1d8   : > { %555 = vst.msk [vmem:[%s1496_s19 + $0x88] sm:$0xff] %vm537_vm2, %v532_v4 }
 0x1da   : > { %v518_v7 = vpop.xlane.xlu0 %517 }
 0x1db   : > { %v520_v6 = vpop.xlane.xlu1 %519  ;;  %548 = vst.msk [vmem:[%s1496_s19 + $0x50] sm:$0xff] %vm537_vm2, %v518_v7 }
 0x1dc   : > { %549 = vst.msk [vmem:[%s1496_s19 + $0x58] sm:$0xff] %vm537_vm2, %v520_v6 }
 0x1de   : > { %v514_v9 = vpop.xlane.xlu0 %513 }
 0x1df   : > { %v516_v8 = vpop.xlane.xlu1 %515  ;;  %546 = vst.msk [vmem:[%s1496_s19 + $0x40] sm:$0xff] %vm537_vm2, %v514_v9 }
 0x1e0   : > { %547 = vst.msk [vmem:[%s1496_s19 + $0x48] sm:$0xff] %vm537_vm2, %v516_v8  ;;  %564 = sbr.rel (!%p1654_p5) target bundleno = 541 (0x21d), region = 44 }
 0x1e2   : > { %v534_v11 = vpop.xlane.xlu0 %533 }
 0x1e3   : > { %v536_v10 = vpop.xlane.xlu1 %535  ;;  %556 = vst.msk [vmem:[%s1496_s19 + $0x90] sm:$0xff] %vm537_vm2, %v534_v11 }
 0x1e4   : > { %557 = vst.msk [vmem:[%s1496_s19 + $0x98] sm:$0xff] %vm537_vm2, %v536_v10 }
 0x1e5   : > { %s1665_s29 = smov (!%p567_p11, %s566_s29), 20 }
 0x1e6   : > { %s903_s5 = sshll.u32 %s1665_s29, 7 }
 0x1e7   : > { %p906_p4 = scmp.eq.s32.totalorder %s903_s5, 0 }
 0x1e8   : > { %1106 = sdivrem.u32 (!%p906_p4), %s1665_s29, 20 }
 0x1e9   : > { %575 = sbr.rel (%p906_p4) target bundleno = 541 (0x21d), region = 48 }
 0x1f1   : > { %s1551_s23 = spop.drf %1106 }
 0x1f2   : > { %p907_p2 = scmp.le.s32.totalorder %s1551_s23, 0 }
 0x1f3   : > { %s1655_s16 = smov (!%p907_p2), %s1545_s4  ;;  %s1656_s6 = smov (!%p907_p2), %s1496_s19 }
 0x1f4   : > { %817 = sbr.rel (%p907_p2) target bundleno = 516 (0x204), region = 130  ;;  %s1560_s7 = smov (!%p907_p2), 0  }
 0x1f5   : > { %s1562_s8 = smov (!%p907_p2), 0  }
 0x1f9 LB: >> { %v678_v12 = vld [vmem:[%s1240_s6] sm:$0xff]  ;;  %v680_v13 = vld [vmem:[%s1240_s6 + $0x8] sm:$0xff]  ;;  %v682_v14 = vld [vmem:[%s1240_s6 + $0x10] sm:$0xff]  ;;  %s718_s10 = sadd.s32 1, %s1244_s7  ;;  %s672_s8 = sadd.s32 1, %s1248_s8   ;;  %s1248_s8 = sphi %s1562_s8, %s672_s8   ;;  %s1244_s7 = sphi %s1560_s7, %s1657_s7   ;;  %s1240_s6 = sphi %s1656_s6, %s723_s6   ;;  %s1236_s16 = sphi %s1655_s16, %s724_s16  }
 0x1fa   : >> { %679 = vst [vmem:[%s1236_s16] sm:$0xff] %v678_v12  ;;  %681 = vst [vmem:[%s1236_s16 + $0x8] sm:$0xff] %v680_v13  ;;  %v684_v15 = vld [vmem:[%s1240_s6 + $0x18] sm:$0xff]  ;;  %v686_v16 = vld [vmem:[%s1240_s6 + $0x20] sm:$0xff]  ;;  %p719_p3 = scmp.ge.s32.totalorder %s718_s10, %s1551_s23  ;;  %p671_p1 = scmp.ge.s32.totalorder %s672_s8, %s1551_s23 }
 0x1fb   : >> { %683 = vst [vmem:[%s1236_s16 + $0x10] sm:$0xff] %v682_v14  ;;  %v688_v17 = vld [vmem:[%s1240_s6 + $0x28] sm:$0xff]  ;;  %685 = vst [vmem:[%s1236_s16 + $0x18] sm:$0xff] %v684_v15  ;;  %v690_v18 = vld [vmem:[%s1240_s6 + $0x30] sm:$0xff] }
 0x1fc   : >> { %687 = vst [vmem:[%s1236_s16 + $0x20] sm:$0xff] %v686_v16  ;;  %689 = vst [vmem:[%s1236_s16 + $0x28] sm:$0xff] %v688_v17  ;;  %v692_v19 = vld [vmem:[%s1240_s6 + $0x38] sm:$0xff]  ;;  %v694_v20 = vld [vmem:[%s1240_s6 + $0x40] sm:$0xff]  ;;  %s1667_s10 = smov (%p719_p3, %s718_s10), 0 }
 0x1fd   : >> { %691 = vst [vmem:[%s1236_s16 + $0x30] sm:$0xff] %v690_v18  ;;  %693 = vst [vmem:[%s1236_s16 + $0x38] sm:$0xff] %v692_v19  ;;  %v696_v21 = vld [vmem:[%s1240_s6 + $0x48] sm:$0xff]  ;;  %v698_v22 = vld [vmem:[%s1240_s6 + $0x50] sm:$0xff]  ;;  %s721_s12 = smul.u32 160, %s1667_s10  ;;  %s1657_s7 = smov %s1667_s10 }
 0x1fe   : >> { %695 = vst [vmem:[%s1236_s16 + $0x40] sm:$0xff] %v694_v20  ;;  %v700_v23 = vld [vmem:[%s1240_s6 + $0x58] sm:$0xff]  ;;  %697 = vst [vmem:[%s1236_s16 + $0x48] sm:$0xff] %v696_v21  ;;  %v702_v24 = vld [vmem:[%s1240_s6 + $0x60] sm:$0xff] }
 0x1ff   : >> { %699 = vst [vmem:[%s1236_s16 + $0x50] sm:$0xff] %v698_v22  ;;  %701 = vst [vmem:[%s1236_s16 + $0x58] sm:$0xff] %v700_v23  ;;  %v704_v25 = vld [vmem:[%s1240_s6 + $0x68] sm:$0xff]  ;;  %v706_v26 = vld [vmem:[%s1240_s6 + $0x70] sm:$0xff]  ;;  %674 = sbr.rel (!%p671_p1) target bundleno = 505 (0x1f9), region = 136 }
 0x200   : >> { %703 = vst [vmem:[%s1236_s16 + $0x60] sm:$0xff] %v702_v24  ;;  %705 = vst [vmem:[%s1236_s16 + $0x68] sm:$0xff] %v704_v25  ;;  %v708_v27 = vld [vmem:[%s1240_s6 + $0x78] sm:$0xff]  ;;  %v710_v28 = vld [vmem:[%s1240_s6 + $0x80] sm:$0xff] }
 0x201   : >> { %707 = vst [vmem:[%s1236_s16 + $0x70] sm:$0xff] %v706_v26  ;;  %v712_v29 = vld [vmem:[%s1240_s6 + $0x88] sm:$0xff]  ;;  %709 = vst [vmem:[%s1236_s16 + $0x78] sm:$0xff] %v708_v27  ;;  %v714_v30 = vld [vmem:[%s1240_s6 + $0x90] sm:$0xff] }
 0x202   : >> { %711 = vst [vmem:[%s1236_s16 + $0x80] sm:$0xff] %v710_v28  ;;  %713 = vst [vmem:[%s1236_s16 + $0x88] sm:$0xff] %v712_v29  ;;  %v716_v31 = vld [vmem:[%s1240_s6 + $0x98] sm:$0xff]  ;;  %s723_s6 = scalar_lea.vmem %s1496_s19, %s721_s12 [#allocation6]  }
 0x203   : >> { %715 = vst [vmem:[%s1236_s16 + $0x90] sm:$0xff] %v714_v30  ;;  %717 = vst [vmem:[%s1236_s16 + $0x98] sm:$0xff] %v716_v31  ;;  %s724_s16 = scalar_lea.vmem %s1545_s4, %s721_s12  }
 0x204 PF: > { %1108 = sdivrem.u32 %s1665_s29, 20 }
 0x205   : > { %s908_s18 = smul.u32 160, %s1551_s23 }
 0x207   : > { %s729_s21 = scalar_lea.vmem %s1496_s19, %s908_s18 [#allocation6]   ;;  %s731_s25 = scalar_lea.vmem %s1545_s4, %s908_s18  }
 0x20d   : > { %s1109_s27 = spop.drf %1108 }
 0x20e   : > { %p910_p6 = scmp.le.s32.totalorder %s1109_s27, 0 }
 0x20f   : > { %s1250_s22 = smov (!%p910_p6), %s731_s25   ;;  %s1254_s24 = smov (!%p910_p6), %s729_s21  }
 0x210   : > { %831 = sbr.rel (%p910_p6) target bundleno = 541 (0x21d), region = 141  ;;  %s1258_s9 = smov (!%p910_p6), 0  }
 0x211   : > { %s1262_s11 = smov (!%p910_p6), 0  }
 0x215 LB: >> { %v741_v32 = vld [vmem:[%s1256_s24] sm:$0xff]  ;;  %s743_s26 = sadd.s32 1, %s1260_s9  ;;  %s735_s11 = sadd.s32 1, %s1264_s11   ;;  %s1264_s11 = sphi %s1262_s11, %s735_s11   ;;  %s1260_s9 = sphi %s1258_s9, %s1259_s9   ;;  %s1256_s24 = sphi %s1254_s24, %s748_s24   ;;  %s1252_s22 = sphi %s1250_s22, %s749_s22  }
 0x216   : >> { %742 = vst [vmem:[%s1252_s22] sm:$0xff] %v741_v32  ;;  %p744_p7 = scmp.ge.s32.totalorder %s743_s26, %s1109_s27  ;;  %p734_p9 = scmp.ge.s32.totalorder %s735_s11, %s1109_s27 }
 0x218   : >> { %s1669_s26 = smov (%p744_p7, %s743_s26), 0  ;;  %737 = sbr.rel (!%p734_p9) target bundleno = 533 (0x215), region = 147 }
 0x219   : >> { %s911_s19 = sshll.u32 %s1669_s26, 3  ;;  %s1259_s9 = smov %s1669_s26  }
 0x21a   : >> { %s748_s24 = scalar_lea.vmem %s729_s21, %s911_s19 [#allocation6]   ;;  %s749_s22 = scalar_lea.vmem %s731_s25, %s911_s19  }
 0x21d PF: > { %p14_p8 = scmp.ge.s32.totalorder %s1314_s17, 4   ;;  %s1658_s12 = smov %s1224_s13 }
 0x21e   : > { %s1659_s13 = smov %s1228_s14  ;;  %s1660_s14 = smov %s1324_s20 }
 0x21f   : > { %s1661_s15 = smov %s1314_s17  ;;  %16 = sbr.rel (!%p14_p8) target bundleno = 4 (0x4), region = 158 }
 0x224   :  { %765 = vsyncpa [#allocation3], 1 }
 0x225   :  { %767 = vsyncpa [#allocation3 + $0x1], 1 }
 0x226   :  { %768 = vsyncpa [#allocation5], 1 }

</bundles_post_ra>
